<compile_context>
chip_gen: v7x
topology: tpu7x:2x2x1
jax: 0.10.0
libtpu: 0.0.40
codegen_flags: <defaults>
</compile_context>

<pallas_src>
import functools

import jax
import jax.numpy as jnp
from jax.experimental import pallas as pl
from jax.experimental.pallas import tpu as pltpu


def _cdiv(a, b):
    return -(-a // b)


def _round_up(a, b):
    return _cdiv(a, b) * b


def _vmem_capacity_bytes():
    try:
        info = pltpu.get_tpu_info()
        cap = getattr(info, "vmem_capacity_bytes", None)
        if cap:
            return int(cap)
    except Exception:
        pass
    return 64 * 1024 * 1024          # conservative (v7x-sized) fallback


def _budget():
    """(target x-block bytes [lane-padded f32], scoped vmem limit) per TPU gen."""
    cap = _vmem_capacity_bytes()
    if cap <= 64 * 1024 * 1024:       # v7x-class: 64 MiB VMEM per TensorCore
        return 2 * 1024 * 1024, 40 * 1024 * 1024
    return 4 * 1024 * 1024, 64 * 1024 * 1024   # v5e / v6e: 128 MiB VMEM


def _sublane_align(dtype):
    # Sub-32-bit dtypes pack along sublanes; keep tiles native-tile aligned.
    return max(8, 32 // jnp.dtype(dtype).itemsize)


def _choose_tile(extent, bytes_per_unit, align, ensure_split, target_bytes):
    """Pick a tile length along one axis of the x block.

    extent:         full axis length
    bytes_per_unit: lane-padded *f32* bytes of one cross-section along this axis
    align:          divisor required of a partial tile (8/16 sublanes, 128 lanes)
    ensure_split:   aim for >= 2 (and an even number of) grid blocks so both of
                    v7x's TensorCores get balanced work
    """
    if extent <= align:
        return extent                        # full-extent block (always legal)
    units = max(1, target_bytes // max(bytes_per_unit, 1))
    t = max(align, (units // align) * align)
    t = min(t, extent)
    if not ensure_split:
        return extent if t >= extent else t
    # at least two blocks
    t = min(t, max(align, (_cdiv(extent, 2) // align) * align))
    # prefer an even block count (v7x megacore balance); bounded search
    n = _cdiv(extent, t)
    for _ in range(8):
        if n <= 2 or n % 2 == 0 or t <= align:
            break
        t2 = max(align, (_cdiv(extent, n + 1) // align) * align)
        if t2 >= t:
            t2 = t - align
        t = max(align, t2)
        n = _cdiv(extent, t)
    return min(t, extent)


# ----------------------------------------------------------------------------
# Kernel bodies
# ----------------------------------------------------------------------------

def _ln_reduce_lanes_kernel(x_ref, w_ref, b_ref, o_ref, *, eps):
    # x_ref: (TR, C); w_ref/b_ref: (1, C) f32.  Normalize each row over lanes.
    mean = jnp.mean(x_ref[...].astype(jnp.float32), axis=-1, keepdims=True)
    xc = x_ref[...].astype(jnp.float32) - mean
    var = jnp.mean(xc * xc, axis=-1, keepdims=True)            # biased variance
    scale = jax.lax.rsqrt(var + eps) * w_ref[...]
    o_ref[...] = (xc * scale + b_ref[...]).astype(o_ref.dtype)


def _ln_packed_rows_kernel(x_ref, w_ref, b_ref, a_ref, o_ref, *, eps):
    # x_ref: (TR, 128); each 128-lane row packs G = 128//C independent LayerNorm
    # rows of length C.  a_ref: (128, 128) block-diagonal averaging matrix with
    # 1/C inside each CxC diagonal block.  w_ref/b_ref: (1, 128) = weight/bias
    # tiled G times.  Per-group mean/var via MXU keeps every load, VPU op and
    # store lane-dense (unmasked vst).
    a = a_ref[...]
    xf = x_ref[...].astype(jnp.float32)
    mean = jnp.dot(xf, a, precision=jax.lax.Precision.HIGHEST,
                   preferred_element_type=jnp.float32)
    xc = xf - mean
    var = jnp.dot(xc * xc, a, precision=jax.lax.Precision.HIGHEST,
                  preferred_element_type=jnp.float32)          # biased variance
    scale = jax.lax.rsqrt(var + eps) * w_ref[...]
    o_ref[...] = (xc * scale + b_ref[...]).astype(o_ref.dtype)


def _ln_reduce_sublanes_kernel(x_ref, w_ref, b_ref, o_ref, *, eps):
    # x_ref: (TB, C, THW); w_ref/b_ref: (1, C, 1) f32.  Normalize over axis=1
    # (the sublane axis) independently per batch element and spatial position.
    mean = jnp.mean(x_ref[...].astype(jnp.float32), axis=1, keepdims=True)
    xc = x_ref[...].astype(jnp.float32) - mean
    var = jnp.mean(xc * xc, axis=1, keepdims=True)             # biased variance
    scale = jax.lax.rsqrt(var + eps) * w_ref[...]
    o_ref[...] = (xc * scale + b_ref[...]).astype(o_ref.dtype)


# ----------------------------------------------------------------------------
# Wrappers
# ----------------------------------------------------------------------------

def _layer_norm_channels_last(x, weight, bias, eps):
    c = x.shape[-1]
    lead = x.shape[:-1]
    x2 = x.reshape(-1, c)
    rows = x2.shape[0]
    target_bytes, vmem_limit = _budget()
    align_rows = _sublane_align(x.dtype)

    g = (128 // c) if (c < 128 and 128 % c == 0) else 1
    if g > 1 and rows % g == 0:
        # ---- lane-dense packed path (C < 128) ----
        p = g * c                                      # == 128
        xp = x2.reshape(rows // g, p)                  # free, contiguous view
        w_t = jnp.tile(weight.astype(jnp.float32), g).reshape(1, p)
        b_t = jnp.tile(bias.astype(jnp.float32), g).reshape(1, p)
        lane = jnp.arange(p, dtype=jnp.int32)
        avg = ((lane[:, None] // c) == (lane[None, :] // c)).astype(jnp.float32) / c

        rows_p = rows // g
        tile_rows = _choose_tile(rows_p, p * 4, align_rows, True, target_bytes)
        grid = (_cdiv(rows_p, tile_rows),)

        out = pl.pallas_call(
            functools.partial(_ln_packed_rows_kernel, eps=eps),
            out_shape=jax.ShapeDtypeStruct((rows_p, p), x.dtype),
            grid_spec=pltpu.PrefetchScalarGridSpec(
                num_scalar_prefetch=0,
                grid=grid,
                in_specs=[
                    pl.BlockSpec((tile_rows, p), lambda i: (i, 0)),
                    pl.BlockSpec((1, p), lambda i: (0, 0)),
                    pl.BlockSpec((1, p), lambda i: (0, 0)),
                    pl.BlockSpec((p, p), lambda i: (0, 0)),
                ],
                out_specs=pl.BlockSpec((tile_rows, p), lambda i: (i, 0)),
            ),
            compiler_params=pltpu.CompilerParams(
                dimension_semantics=("parallel",),
                vmem_limit_bytes=vmem_limit,
            ),
        )(xp, w_t, b_t, avg)
        return out.reshape(*lead, c)

    # ---- plain path (C >= 128, or rows not divisible by the packing factor) ----
    w2 = weight.astype(jnp.float32).reshape(1, c)
    b2 = bias.astype(jnp.float32).reshape(1, c)
    # lane-padded f32 bytes per row (accounts for C<128 lane padding and bf16
    # widening to f32 in vregs/scratch, incl. v5e's f32-only VPU).
    bytes_per_row = _round_up(c, 128) * 4
    tile_rows = _choose_tile(rows, bytes_per_row, align_rows, True, target_bytes)
    grid = (_cdiv(rows, tile_rows),)

    out = pl.pallas_call(
        functools.partial(_ln_reduce_lanes_kernel, eps=eps),
        out_shape=jax.ShapeDtypeStruct((rows, c), x.dtype),
        grid_spec=pltpu.PrefetchScalarGridSpec(
            num_scalar_prefetch=0,
            grid=grid,
            in_specs=[
                pl.BlockSpec((tile_rows, c), lambda i: (i, 0)),
                pl.BlockSpec((1, c), lambda i: (0, 0)),
                pl.BlockSpec((1, c), lambda i: (0, 0)),
            ],
            out_specs=pl.BlockSpec((tile_rows, c), lambda i: (i, 0)),
        ),
        compiler_params=pltpu.CompilerParams(
            dimension_semantics=("parallel",),
            vmem_limit_bytes=vmem_limit,
        ),
    )(x2, w2, b2)
    return out.reshape(*lead, c)


def _layer_norm_channels_first(x, weight, bias, eps):
    b, c, h, w = x.shape
    hw = h * w
    x3 = x.reshape(b, c, hw)                 # free view: C stays on sublanes
    w2 = weight.astype(jnp.float32).reshape(1, c, 1)
    b2 = bias.astype(jnp.float32).reshape(1, c, 1)
    target_bytes, vmem_limit = _budget()

    # padded f32 bytes of one (C,) column slice along the H*W axis
    pad_c = _round_up(c, _sublane_align(x.dtype))
    col_bytes = pad_c * 4
    tile_hw = _choose_tile(hw, col_bytes, 128, b == 1, target_bytes)
    n_hw = _cdiv(hw, tile_hw)

    if n_hw == 1:
        # One block covers all of H*W; also block over batch so each grid step
        # stays multi-MiB (small feature maps / large batch).
        slab_bytes = pad_c * _round_up(hw, 128) * 4
        tile_b = _choose_tile(b, slab_bytes, 1, True, target_bytes)
    else:
        tile_b = 1
    grid = (_cdiv(b, tile_b), n_hw)

    out = pl.pallas_call(
        functools.partial(_ln_reduce_sublanes_kernel, eps=eps),
        out_shape=jax.ShapeDtypeStruct((b, c, hw), x.dtype),
        grid_spec=pltpu.PrefetchScalarGridSpec(
            num_scalar_prefetch=0,
            grid=grid,
            in_specs=[
                pl.BlockSpec((tile_b, c, tile_hw), lambda i, j: (i, 0, j)),
                pl.BlockSpec((1, c, 1), lambda i, j: (0, 0, 0)),
                pl.BlockSpec((1, c, 1), lambda i, j: (0, 0, 0)),
            ],
            out_specs=pl.BlockSpec((tile_b, c, tile_hw), lambda i, j: (i, 0, j)),
        ),
        compiler_params=pltpu.CompilerParams(
            dimension_semantics=("parallel", "parallel"),
            vmem_limit_bytes=vmem_limit,
        ),
    )(x3, w2, b2)
    return out.reshape(b, c, h, w)


def layer_norm(x, weight, bias, eps=1e-6, data_format="channels_last"):
    if data_format not in ("channels_last", "channels_first"):
        raise NotImplementedError
    if data_format == "channels_last":
        return _layer_norm_channels_last(x, weight, bias, eps)
    return _layer_norm_channels_first(x, weight, bias, eps)


# ----------------------------------------------------------------------------
# Reference + tests
# ----------------------------------------------------------------------------

def _ref_layer_norm(x, weight, bias, eps, data_format):
    if data_format == "channels_last":
        mean = jnp.mean(x, axis=-1, keepdims=True)
        var = jnp.mean((x - mean) ** 2, axis=-1, keepdims=True)
        return (x - mean) / jnp.sqrt(var + eps) * weight + bias
    mean = jnp.mean(x, axis=1, keepdims=True)
    var = jnp.mean((x - mean) ** 2, axis=1, keepdims=True)
    xn = (x - mean) / jnp.sqrt(var + eps)
    return weight[None, :, None, None] * xn + bias[None, :, None, None]


if __name__ == "__main__":
    key = jax.random.PRNGKey(0)
    ks = jax.random.split(key, 10)
    eps = 1e-6
    C = 32
    weight = jnp.ones((C,), jnp.float32) + 0.1 * jax.random.normal(ks[0], (C,), jnp.float32)
    bias = 0.1 * jax.random.normal(ks[1], (C,), jnp.float32)

    # channels_first input (B, C, H, W)
    x_cf = jax.random.normal(ks[2], (2, C, 16, 16), jnp.float32)
    y_cf = jax.block_until_ready(layer_norm(x_cf, weight, bias, eps, "channels_first"))
    assert jnp.allclose(y_cf, _ref_layer_norm(x_cf, weight, bias, eps, "channels_first"),
                        atol=1e-4, rtol=1e-4)

    # channels_last input (B, H, W, C), C=32 -> lane-dense packed path (G=4)
    x_cl = jax.random.normal(ks[3], (2, 16, 16, C), jnp.float32)
    y_cl = jax.block_until_ready(layer_norm(x_cl, weight, bias, eps, "channels_last"))
    assert jnp.allclose(y_cl, _ref_layer_norm(x_cl, weight, bias, eps, "channels_last"),
                        atol=1e-4, rtol=1e-4)

    # channels_last with ragged row count (rows % packing factor != 0 -> plain path)
    x_rag = jax.random.normal(ks[4], (3, 7, 5, C), jnp.float32)
    y_rag = jax.block_until_ready(layer_norm(x_rag, weight, bias, eps, "channels_last"))
    assert jnp.allclose(y_rag, _ref_layer_norm(x_rag, weight, bias, eps, "channels_last"),
                        atol=1e-4, rtol=1e-4)

    # channels_last with C >= 128 (plain lane-reduction path, C not mult of 128)
    C2 = 160
    w2 = jnp.ones((C2,), jnp.float32) + 0.1 * jax.random.normal(ks[5], (C2,), jnp.float32)
    b2 = 0.1 * jax.random.normal(ks[6], (C2,), jnp.float32)
    x_big = jax.random.normal(ks[7], (2, 8, 8, C2), jnp.float32)
    y_big = jax.block_until_ready(layer_norm(x_big, w2, b2, eps, "channels_last"))
    assert jnp.allclose(y_big, _ref_layer_norm(x_big, w2, b2, eps, "channels_last"),
                        atol=1e-4, rtol=1e-4)

    # channels_first with ragged spatial extent (H*W not a multiple of 128)
    x_cf_rag = jax.random.normal(ks[8], (2, C, 13, 11), jnp.float32)
    y_cf_rag = jax.block_until_ready(layer_norm(x_cf_rag, weight, bias, eps, "channels_first"))
    assert jnp.allclose(y_cf_rag, _ref_layer_norm(x_cf_rag, weight, bias, eps, "channels_first"),
                        atol=1e-4, rtol=1e-4)

    print("KERNEL_OK")
</pallas_src>

<mosaic_0001>
module attributes {stable_mosaic.version = 11 : i64} {
  func.func @_ln_reduce_sublanes_kernel(%arg0: i32, %arg1: i32, %arg2: memref<1x32x256xf32, #tpu.memory_space<vmem>>, %arg3: memref<1x32x1xf32, #tpu.memory_space<vmem>>, %arg4: memref<1x32x1xf32, #tpu.memory_space<vmem>>, %arg5: memref<1x32x256xf32, #tpu.memory_space<vmem>>) attributes {dimension_semantics = [#tpu.dimension_semantics<parallel>, #tpu.dimension_semantics<parallel>], iteration_bounds = array<i64: 2, 1>, scalar_prefetch = 0 : i64, scratch_operands = 0 : i64, tpu.core_type = #tpu.core_type<tc>, window_params = [{transform_indices = @transform_0, window_bounds = array<i64: 1, 32, 256>}, {pipeline_mode = #tpu.pipeline_mode<synchronous>, transform_indices = @transform_1, window_bounds = array<i64: 1, 32, 1>}, {pipeline_mode = #tpu.pipeline_mode<synchronous>, transform_indices = @transform_2, window_bounds = array<i64: 1, 32, 1>}, {transform_indices = @transform_3, window_bounds = array<i64: 1, 32, 256>}]} {
    %c0 = arith.constant 0 : index
    %c0_0 = arith.constant 0 : index
    %c0_1 = arith.constant 0 : index
    %0 = vector.load %arg2[%c0, %c0_0, %c0_1] : memref<1x32x256xf32, #tpu.memory_space<vmem>>, vector<1x32x256xf32>
    %cst = arith.constant dense<0.000000e+00> : vector<1x256xf32>
    %1 = vector.multi_reduction <add>, %0, %cst [1] : vector<1x32x256xf32> to vector<1x256xf32>
    %2 = vector.shape_cast %1 : vector<1x256xf32> to vector<1x1x256xf32>
    %cst_2 = arith.constant 3.200000e+01 : f32
    %3 = vector.broadcast %cst_2 : f32 to vector<1x1x256xf32>
    %4 = arith.divf %2, %3 : vector<1x1x256xf32>
    %c0_3 = arith.constant 0 : index
    %c0_4 = arith.constant 0 : index
    %c0_5 = arith.constant 0 : index
    %5 = vector.load %arg2[%c0_3, %c0_4, %c0_5] : memref<1x32x256xf32, #tpu.memory_space<vmem>>, vector<1x32x256xf32>
    %6 = vector.broadcast %4 : vector<1x1x256xf32> to vector<1x32x256xf32>
    %7 = arith.subf %5, %6 : vector<1x32x256xf32>
    %8 = arith.mulf %7, %7 : vector<1x32x256xf32>
    %cst_6 = arith.constant dense<0.000000e+00> : vector<1x256xf32>
    %9 = vector.multi_reduction <add>, %8, %cst_6 [1] : vector<1x32x256xf32> to vector<1x256xf32>
    %10 = vector.shape_cast %9 : vector<1x256xf32> to vector<1x1x256xf32>
    %cst_7 = arith.constant 3.200000e+01 : f32
    %11 = vector.broadcast %cst_7 : f32 to vector<1x1x256xf32>
    %12 = arith.divf %10, %11 : vector<1x1x256xf32>
    %cst_8 = arith.constant 9.99999997E-7 : f32
    %13 = vector.broadcast %cst_8 : f32 to vector<1x1x256xf32>
    %14 = arith.addf %12, %13 : vector<1x1x256xf32>
    %15 = math.rsqrt %14 : vector<1x1x256xf32>
    %c0_9 = arith.constant 0 : index
    %c0_10 = arith.constant 0 : index
    %c0_11 = arith.constant 0 : index
    %16 = vector.load %arg3[%c0_9, %c0_10, %c0_11] : memref<1x32x1xf32, #tpu.memory_space<vmem>>, vector<1x32x1xf32>
    %17 = vector.broadcast %15 : vector<1x1x256xf32> to vector<1x32x256xf32>
    %18 = vector.broadcast %16 : vector<1x32x1xf32> to vector<1x32x256xf32>
    %19 = arith.mulf %17, %18 : vector<1x32x256xf32>
    %20 = arith.mulf %7, %19 : vector<1x32x256xf32>
    %c0_12 = arith.constant 0 : index
    %c0_13 = arith.constant 0 : index
    %c0_14 = arith.constant 0 : index
    %21 = vector.load %arg4[%c0_12, %c0_13, %c0_14] : memref<1x32x1xf32, #tpu.memory_space<vmem>>, vector<1x32x1xf32>
    %22 = vector.broadcast %21 : vector<1x32x1xf32> to vector<1x32x256xf32>
    %23 = arith.addf %20, %22 : vector<1x32x256xf32>
    %c0_15 = arith.constant 0 : index
    %c0_16 = arith.constant 0 : index
    %c0_17 = arith.constant 0 : index
    %24 = vector.load %arg5[%c0_15, %c0_16, %c0_17] : memref<1x32x256xf32, #tpu.memory_space<vmem>>, vector<1x32x256xf32>
    tpu.vector_store %arg5[%c0_15, %c0_16, %c0_17], %23 {strides = array<i32>} : memref<1x32x256xf32, #tpu.memory_space<vmem>>, vector<1x32x256xf32>,
    return
  }
  func.func @transform_0(%arg0: i32, %arg1: i32) -> (i32, i32, i32) {
    %c0_i32 = arith.constant 0 : i32
    %c0_i32_0 = arith.constant 0 : i32
    return %arg0, %c0_i32, %arg1 : i32, i32, i32
  }
  func.func @transform_1(%arg0: i32, %arg1: i32) -> (i32, i32, i32) {
    %c0_i32 = arith.constant 0 : i32
    %c0_i32_0 = arith.constant 0 : i32
    %c0_i32_1 = arith.constant 0 : i32
    %c0_i32_2 = arith.constant 0 : i32
    return %c0_i32, %c0_i32_0, %c0_i32_1 : i32, i32, i32
  }
  func.func @transform_2(%arg0: i32, %arg1: i32) -> (i32, i32, i32) {
    %c0_i32 = arith.constant 0 : i32
    %c0_i32_0 = arith.constant 0 : i32
    %c0_i32_1 = arith.constant 0 : i32
    %c0_i32_2 = arith.constant 0 : i32
    return %c0_i32, %c0_i32_0, %c0_i32_1 : i32, i32, i32
  }
  func.func @transform_3(%arg0: i32, %arg1: i32) -> (i32, i32, i32) {
    %c0_i32 = arith.constant 0 : i32
    %c0_i32_0 = arith.constant 0 : i32
    return %arg0, %c0_i32, %arg1 : i32, i32, i32
  }
}

</mosaic_0001>

<bundles_post_ra>
// kernel: tpu_custom_call.1
= control target key start
LH: loop header
LB: loop body
LE: loop exit
PB: predicated region body
PF: predicated region fallthrough
CT: control target
= control target key end

     0   :  { %8 = vsyncpa [#allocation3], 0  ;;  %s915_s0 = inlined_call_operand.hbm [shape: f32[2,32,256], index: 0, kind: input, shape index: {}]   ;;  %s916_s1 = inlined_call_operand.vmem [shape: f32[1,32,1], index: 1, kind: input, shape index: {}]   ;;  %s917_s2 = inlined_call_operand.vmem [shape: f32[1,32,1], index: 2, kind: input, shape index: {}]   ;;  %s918_s3 = inlined_call_operand.hbm [shape: f32[2,32,256], index: 3, kind: output, shape index: {}]  }
   0x1   :  { %10 = vsyncpa [#allocation3 + $0x1], 0 }
   0x2   :  { %11 = vsyncpa [#allocation4], 0 }
   0x3   :  { %13 = vsyncpa [#allocation4 + $0x1], 0  ;;  %s692_s12 = smov 0   ;;  %s694_s13 = smov 0  }
   0x4   :  { %s696_s14 = smov 0   ;;  %s698_s15 = smov 0  }
   0x5   :  { %s700_s16 = smov 0   ;;  %s702_s17 = smov 0  }
   0x6 LB: > { %s461_s18 = sadd.s32 4294967295, %s663_s17   ;;  %s462_s19 = sadd.s32 4294967294, %s663_s17   ;;  %s663_s17 = sphi %s702_s17, %s19_s17   ;;  %s659_s16 = sphi %s700_s16, %s933_s16   ;;  %s655_s15 = sphi %s698_s15, %s932_s15   ;;  %s651_s14 = sphi %s696_s14, %s931_s14   ;;  %s647_s13 = sphi %s694_s13, %s930_s13   ;;  %s643_s12 = sphi %s692_s12, %s929_s12  }
   0x7   : > { %s31_s20 = sadd.s32 1, %s659_s16  ;;  %s40_s21 = sadd.s32 1, %s651_s14 }
   0x8   : > { %p33_p0 = scmp.ge.s32.totalorder %s31_s20, 2  ;;  %p47_p1 = scmp.ne.s32.totalorder %s651_s14, %s647_s13 }
   0x9   : > { %p48_p2 = scmp.eq.s32.totalorder %s663_s17, 0  ;;  %p53_p3 = scmp.ne.s32.totalorder %s647_s13, %s643_s12 }
   0xa   : > { %s935_s20 = smov (%p33_p0, %s31_s20), 0  ;;  %p54_p5 = scmp.eq.s32.totalorder %s461_s18, 0 }
   0xb   : > { %p733_p4 = por %p48_p2, %p47_p1  ;;  %s35_s23 = ssub.s32 %s659_s16, %s935_s20 }
   0xc   : > { %p121_p6 = scmp.eq.s32.totalorder %s461_s18, 1  ;;  %p38_p7 = scmp.eq.s32.totalorder %s35_s23, 0 }
   0xd   : > { %p739_p8 = por %p54_p5, %p53_p3  ;;  %p127_p10 = scmp.eq.s32.totalorder %s462_s19, 1 }
   0xe   : > { %p743_p9 = por %p121_p6, %p47_p1  ;;  %p490_p13 = scmp.lt.s32.totalorder %s663_s17, 2 }
   0xf   : > { %s748_s26 = scalar_select %p38_p7, %s651_s14, %s40_s21  }
  0x10   : > { %s922_s25 = scalar_select %p743_p9, 1, 0 }
  0x11   : > { %p750_p11 = por %p127_p10, %p53_p3  ;;  %s153_s28 = sand.u32 1, %s651_s14  }
  0x12   : > { %s465_s29 = sshll.u32 %s153_s28, 6  ;;  %s476_s30 = sshll.u32 %s659_s16, 10 }
  0x13   : > { %s923_s27 = scalar_select %p750_p11, 1, 0 }
  0x14   : > { %s761_s6 = scalar_lea.hbm %s915_s0, %s476_s30  ;;  %s157_s7 = scalar_lea.vmem [#allocation2], %s465_s29 }
  0x15   : > { %s166_s8 = sshll.u32 %s157_s7, 4  ;;  %p767_p0 = pnand %p490_p13, %p733_p4  ;;  %s763_s8 = int_to_ptr.vmem [resolvable:$true] %s166_s8 }
  0x16   : > { %s772_s10 = scalar_lea.sflag [#allocation3], %s153_s28  ;;  %s551_s11 = scalar_lea.hbm %s761_s6, 1024 }
  0x17   : > { %p552_p2 = scmp.ne.s32.totalorder %s761_s6, %s551_s11  ;;  %p553_p3 = pneg %p767_p0 }
  0x18   : > { %s556_s21 = scalar_lea.hbm %s915_s0, 2048  ;;  %p557_p4 = scmp.lt.u32.totalorder %s761_s6, %s915_s0 }
  0x19   : > { %p554_p5 = pnand %p553_p3, %p552_p2  ;;  %p558_p7 = scmp.lt.u32.totalorder %s556_s21, %s551_s11 }
  0x1a   : > { %p560_p13 = scmp.lt.u32.totalorder %s551_s11, %s761_s6 }
  0x1b   : > { %p555_p6 = pneg %p554_p5  ;;  %p559_p10 = por %p558_p7, %p557_p4 }
  0x1d   : > { %p561_p12 = por %p560_p13, %p559_p10 }
  0x1f   : > { %p562_p1 = pnand %p561_p12, %p555_p6 }
  0x21   : > { %565 = shalt.err (!%p562_p1)
}
  0x22   : > { %s566_s28 = scalar_lea.vmem %s763_s8, 1024  ;;  %s665_s29 = smov [#allocation2]  }
  0x23   : > { %p567_p2 = scmp.ne.s32.totalorder %s763_s8, %s566_s28  ;;  %s571_s30 = sshll.u32 %s665_s29, 4  ;;  %s572_s30 = int_to_ptr.vmem [resolvable:$false] %s571_s30 }
  0x24   : > { %s573_s4 = scalar_lea.vmem %s572_s30, 2048  ;;  %p574_p9 = scmp.lt.s32.totalorder %s763_s8, %s572_s30 }
  0x25   : > { %p569_p5 = pnand %p567_p2, %p553_p3  ;;  %p575_p4 = scmp.lt.s32.totalorder %s573_s4, %s566_s28 }
  0x27   : > { %p570_p11 = pneg %p569_p5  ;;  %p576_p7 = por %p575_p4, %p574_p9 }
  0x29   : > { %p577_p10 = pnand %p576_p7, %p570_p11 }
  0x2b   : > { %580 = shalt.err (!%p577_p10)
}
  0x2c   : > { %s666_s5 = smov 256   ;;  %s667_s7 = smov 16  }
  0x2d   : > { %485 = dma.hbm_to_vmem [thread:$0]  (!%p767_p0), %s761_s6, 1024, %s763_s8, %s772_s10, %s666_s5, %s666_s5, %s667_s7  }
  0x2e   : > { %p174_p12 = scmp.lt.s32.totalorder %s663_s17, 3  ;;  %p925_p1 = scmp.ge.s32.totalorder %s663_s17, 1 }
  0x30   : > { %p175_p3 = pnand %p925_p1, %p174_p12 }
  0x31   : > { %s804_s11 = sand.u32 (!%p175_p3), 1, %s647_s13  }
  0x32   : > { %178 = sbr.rel (%p175_p3) target bundleno = 218 (0xda), region = 32  ;;  %s469_s18 = sshll.u32 (!%p175_p3), %s804_s11, 6 }
  0x33   : > { %s181_s19 = scalar_lea.sflag (!%p175_p3), [#allocation3], %s804_s11  ;;  %s810_s21 = scalar_lea.vmem (!%p175_p3), [#allocation2], %s469_s18 }
  0x39   : > { %634 = dma.done.wait (%p739_p8), %s181_s19, 1024  }
  0x3a   : > { %636 = vsyncadd (%p739_p8), %s181_s19, 4294966272  ;;  %v668_v0 = vmov 0   ;;  %v280_v1 = vld [vmem:[%s916_s1 + $0x10] sm:$0xff]  ;;  %v278_v2 = vld [vmem:[%s916_s1] sm:$0xff]  ;;  %s477_s10 = sshll.u32 %s655_s15, 10  ;;  %s359_s23 = scalar_lea.sflag [#allocation4], %s804_s11 }
  0x3b   : > { %546 = vset.pattern.permute.xlu1 %v668_v0  ;;  %545 = vset.pattern.permute.xlu0 %v668_v0  ;;  %v281_v3 = vld [vmem:[%s916_s1 + $0x18] sm:$0xff]  ;;  %v279_v4 = vld [vmem:[%s916_s1 + $0x8] sm:$0xff]  ;;  %v318_v6 = vld [vmem:[%s917_s2] sm:$0xff]  ;;  %s866_s22 = scalar_lea.hbm %s918_s3, %s477_s10  ;;  %p926_p9 = scmp.ne.s32.totalorder %s922_s25, 0 }
  0x3c   : > { %294 = vperm.xlu1 %546, %v280_v1   ;;  %284 = vperm.xlu0 %545, %v278_v2   ;;  %v319_v5 = vld [vmem:[%s917_s2 + $0x8] sm:$0xff]  ;;  %v321_v7 = vld [vmem:[%s917_s2 + $0x18] sm:$0xff]  ;;  %v320_v8 = vld [vmem:[%s917_s2 + $0x10] sm:$0xff]  ;;  %s669_s28 = smov [#allocation5]  }
  0x3d   : > { %v209_v9 = vld [vmem:[%s810_s21] sm:$0xff]  ;;  %v211_v10 = vld [vmem:[%s810_s21 + $0x10] sm:$0xff]  ;;  %v210_v11 = vld [vmem:[%s810_s21 + $0x8] sm:$0xff]  ;;  %s585_s29 = sshll.u32 %s669_s28, 4  ;;  %s586_s29 = int_to_ptr.vmem [resolvable:$false] %s585_s29 }
  0x3e   : > { %v212_v12 = vld [vmem:[%s810_s21 + $0x18] sm:$0xff]  ;;  %v217_v13 = vadd.f32 %v211_v10, %v209_v9  ;;  %v213_v14 = vld [vmem:[%s810_s21 + $0x20] sm:$0xff]  ;;  %v214_v16 = vld [vmem:[%s810_s21 + $0x28] sm:$0xff]  ;;  %s587_s30 = scalar_lea.vmem %s586_s29, 2048 }
  0x3f   : > { %v226_v15 = vadd.f32 %v212_v12, %v210_v11  ;;  %v215_v18 = vld [vmem:[%s810_s21 + $0x30] sm:$0xff]  ;;  %v216_v20 = vld [vmem:[%s810_s21 + $0x38] sm:$0xff]  ;;  %s206_s21 = scalar_lea.vmem [#allocation5], %s469_s18 }
  0x40   : > { %299 = vperm.xlu1 %546, %v281_v3   ;;  %289 = vperm.xlu0 %545, %v279_v4   ;;  %v218_v17 = vadd.f32 %v217_v13, %v213_v14  ;;  %s374_s9 = sshll.u32 %s206_s21, 4  ;;  %s859_s9 = int_to_ptr.vmem [resolvable:$true] %s374_s9 }
  0x41   : > { %v227_v19 = vadd.f32 %v226_v15, %v214_v16  ;;  %s581_s24 = scalar_lea.vmem %s859_s9, 1024  ;;  %p588_p6 = scmp.lt.s32.totalorder %s859_s9, %s586_s29 }
  0x42   : > { %v219_v21 = vadd.f32 %v218_v17, %v215_v18  ;;  %p582_p8 = scmp.ne.s32.totalorder %s859_s9, %s581_s24  ;;  %p589_p13 = scmp.lt.s32.totalorder %s587_s30, %s581_s24 }
  0x43   : > { %v228_v22 = vadd.f32 %v227_v19, %v216_v20 }
  0x44   : > { %329 = vperm.xlu1 %546, %v319_v5   ;;  %324 = vperm.xlu0 %545, %v318_v6   ;;  %v220_v23 = vrot.slane %v219_v21, 4  ;;  %p583_p11 = pnand %p582_p8, %p926_p9  ;;  %p590_p2 = por %p589_p13, %p588_p6 }
  0x45   : > { %v229_v24 = vrot.slane %v228_v22, 4 }
  0x46   : > { %v221_v25 = vadd.f32 %v220_v23, %v219_v21  ;;  %p584_p0 = pneg %p583_p11 }
  0x47   : > { %v230_v26 = vadd.f32 %v229_v24, %v228_v22 }
  0x48   : > { %339 = vperm.xlu1 %546, %v321_v7   ;;  %334 = vperm.xlu0 %545, %v320_v8   ;;  %v222_v27 = vrot.slane %v221_v25, 2  ;;  %p591_p5 = pnand %p590_p2, %p584_p0 }
  0x49   : > { %v231_v28 = vrot.slane %v230_v26, 2 }
  0x4a   : > { %v223_v29 = vadd.f32 %v222_v27, %v221_v25 }
  0x4b   : > { %v232_v30 = vadd.f32 %v231_v28, %v230_v26 }
  0x4c   : > { %v224_v31 = vrot.slane %v223_v29, 1 }
  0x4d   : > { %v233_v32 = vrot.slane %v232_v30, 1 }
  0x4e   : > { %v225_v33 = vadd.f32 %v224_v31, %v223_v29 }
  0x4f   : > { %v234_v34 = vadd.f32 %v233_v32, %v232_v30 }
  0x50   : > { %v236_v35 = vmul.f32 0.03125, %v225_v33 }
  0x51   : > { %v237_v36 = vmul.f32 0.03125, %v234_v34 }
  0x52   : > { %v238_v37 = vsub.f32 %v209_v9, %v236_v35  ;;  %v240_v38 = vsub.f32 %v211_v10, %v236_v35  ;;  %v848_v41 = vsub.f32 %v213_v14, %v236_v35  ;;  %v244_v47 = vsub.f32 %v215_v18, %v236_v35 }
  0x53   : > { %v239_v39 = vsub.f32 %v210_v11, %v237_v36  ;;  %v241_v40 = vsub.f32 %v212_v12, %v237_v36  ;;  %v850_v44 = vsub.f32 %v214_v16, %v237_v36  ;;  %v245_v50 = vsub.f32 %v216_v20, %v237_v36 }
  0x54   : > { %v246_v42 = vmul.f32 %v238_v37, %v238_v37  ;;  %v248_v43 = vmul.f32 %v240_v38, %v240_v38  ;;  %v250_v48 = vmul.f32 %v848_v41, %v848_v41  ;;  %v252_v53 = vmul.f32 %v244_v47, %v244_v47 }
  0x55   : > { %v247_v45 = vmul.f32 %v239_v39, %v239_v39  ;;  %v249_v46 = vmul.f32 %v241_v40, %v241_v40  ;;  %v251_v51 = vmul.f32 %v850_v44, %v850_v44  ;;  %v253_v55 = vmul.f32 %v245_v50, %v245_v50 }
  0x56   : > { %v254_v49 = vadd.f32 %v248_v43, %v246_v42 }
  0x57   : > { %v263_v52 = vadd.f32 %v249_v46, %v247_v45 }
  0x58   : > { %v255_v54 = vadd.f32 %v254_v49, %v250_v48 }
  0x59   : > { %v264_v56 = vadd.f32 %v263_v52, %v251_v51 }
  0x5a   : > { %v256_v57 = vadd.f32 %v255_v54, %v252_v53 }
  0x5b   : > { %v265_v58 = vadd.f32 %v264_v56, %v253_v55 }
  0x5c   : > { %v257_v59 = vrot.slane %v256_v57, 4 }
  0x5d   : > { %v266_v60 = vrot.slane %v265_v58, 4 }
  0x5e   : > { %v258_v61 = vadd.f32 %v257_v59, %v256_v57 }
  0x5f   : > { %v267_v62 = vadd.f32 %v266_v60, %v265_v58 }
  0x60   : > { %v259_v63 = vrot.slane %v258_v61, 2 }
  0x61   : > { %v268_v0 = vrot.slane %v267_v62, 2 }
  0x62   : > { %v260_v1 = vadd.f32 %v259_v63, %v258_v61 }
  0x63   : > { %v269_v2 = vadd.f32 %v268_v0, %v267_v62 }
  0x64   : > { %v261_v3 = vrot.slane %v260_v1, 1 }
  0x65   : > { %v270_v4 = vrot.slane %v269_v2, 1 }
  0x66   : > { %v262_v5 = vadd.f32 %v261_v3, %v260_v1 }
  0x67   : > { %v271_v6 = vadd.f32 %v270_v4, %v269_v2 }
  0x68   : > { %v272_v7 = vmul.f32 0.03125, %v262_v5 }
  0x69   : > { %v273_v8 = vmul.f32 0.03125, %v271_v6 }
  0x6a   : > { %v274_v9 = vadd.f32 1e-06, %v272_v7 }
  0x6b   : > { %v275_v10 = vadd.f32 1e-06, %v273_v8 }
  0x6c   : > { %547 = vrsqrt.f32 %v274_v9 }
  0x6d   : > { %549 = vrsqrt.f32 %v275_v10 }
  0x76   : > { %v548_v11 = vpop.eup %547 }
  0x77   : > { %v550_v12 = vpop.eup %549 }
  0xbb   : > { %v295_v13 = vpop.permute.xlu1 %294  ;;  %v285_v14 = vpop.permute.xlu0 %284 }
  0xbc   : > { %v302_v15 = vmul.f32 %v548_v11, %v285_v14  ;;  %v303_v16 = vmul.f32 %v550_v12, %v285_v14  ;;  %v306_v21 = vmul.f32 %v548_v11, %v295_v13  ;;  %v307_v22 = vmul.f32 %v550_v12, %v295_v13 }
  0xbe   : > { %v310_v23 = vmul.f32 %v302_v15, %v238_v37  ;;  %v311_v24 = vmul.f32 %v303_v16, %v239_v39  ;;  %v314_v37 = vmul.f32 %v306_v21, %v848_v41 }
  0xbf   : > { %v300_v17 = vpop.permute.xlu1 %299  ;;  %v290_v18 = vpop.permute.xlu0 %289 }
  0xc0   : > { %v304_v19 = vmul.f32 %v548_v11, %v290_v18  ;;  %v305_v20 = vmul.f32 %v550_v12, %v290_v18  ;;  %v308_v25 = vmul.f32 %v548_v11, %v300_v17  ;;  %v309_v26 = vmul.f32 %v550_v12, %v300_v17 }
  0xc2   : > { %v312_v27 = vmul.f32 %v304_v19, %v240_v38  ;;  %v313_v28 = vmul.f32 %v305_v20, %v241_v40  ;;  %v316_v35 = vmul.f32 %v308_v25, %v244_v47  ;;  %v317_v36 = vmul.f32 %v309_v26, %v245_v50 }
  0xc3   : > { %v330_v29 = vpop.permute.xlu1 %329  ;;  %v325_v30 = vpop.permute.xlu0 %324  ;;  %v315_v38 = vmul.f32 %v307_v22, %v850_v44 }
  0xc4   : > { %v344_v31 = vadd.f32 %v330_v29, %v312_v27  ;;  %v345_v32 = vadd.f32 %v330_v29, %v313_v28  ;;  %v342_v33 = vadd.f32 %v325_v30, %v310_v23  ;;  %v343_v34 = vadd.f32 %v325_v30, %v311_v24 }
  0xc6   : > { %352 = vst [vmem:[%s206_s21 + $0x10] sm:$0xff] %v344_v31  ;;  %353 = vst [vmem:[%s206_s21 + $0x18] sm:$0xff] %v345_v32 }
  0xc7   : > { %350 = vst [vmem:[%s206_s21] sm:$0xff] %v342_v33  ;;  %351 = vst [vmem:[%s206_s21 + $0x8] sm:$0xff] %v343_v34  ;;  %v340_v39 = vpop.permute.xlu1 %339  ;;  %v335_v40 = vpop.permute.xlu0 %334 }
  0xc8   : > { %v348_v42 = vadd.f32 %v340_v39, %v316_v35  ;;  %v349_v43 = vadd.f32 %v340_v39, %v317_v36  ;;  %v346_v45 = vadd.f32 %v335_v40, %v314_v37  ;;  %v347_v46 = vadd.f32 %v335_v40, %v315_v38 }
  0xca   : > { %356 = vst [vmem:[%s206_s21 + $0x30] sm:$0xff] %v348_v42  ;;  %357 = vst [vmem:[%s206_s21 + $0x38] sm:$0xff] %v349_v43 }
  0xcb   : > { %354 = vst [vmem:[%s206_s21 + $0x20] sm:$0xff] %v346_v45  ;;  %355 = vst [vmem:[%s206_s21 + $0x28] sm:$0xff] %v347_v46 }
  0xcc   : > { %594 = shalt.err (!%p591_p5)
}
  0xcd   : > { %s595_s4 = scalar_lea.hbm %s866_s22, 1024  ;;  %s599_s19 = scalar_lea.hbm %s918_s3, 2048 }
  0xce   : > { %p596_p4 = scmp.ne.s32.totalorder %s866_s22, %s595_s4  ;;  %p600_p12 = scmp.lt.u32.totalorder %s866_s22, %s918_s3 }
  0xcf   : > { %p601_p1 = scmp.lt.u32.totalorder %s599_s19, %s595_s4  ;;  %p603_p8 = scmp.lt.u32.totalorder %s595_s4, %s866_s22 }
  0xd0   : > { %p597_p7 = pnand %p596_p4, %p926_p9 }
  0xd1   : > { %p602_p3 = por %p601_p1, %p600_p12 }
  0xd2   : > { %p598_p10 = pneg %p597_p7 }
  0xd3   : > { %p604_p11 = por %p603_p8, %p602_p3 }
  0xd5   : > { %p605_p0 = pnand %p604_p11, %p598_p10 }
  0xd7   : > { %608 = shalt.err (!%p605_p0)
}
  0xd8   : > { %s670_s21 = smov 256   ;;  %s671_s10 = smov 16  }
  0xd9   : > { %480 = dma.vmem_to_hbm [thread:$0]  (%p926_p9), %s859_s9, 1024, %s866_s22, %s359_s23, %s670_s21, %s670_s21, %s671_s10  }
  0xda PF: > { %s389_s18 = sand.u32 1, %s643_s12   ;;  %p927_p6 = scmp.ne.s32.totalorder %s923_s27, 0 }
  0xdb   : > { %p928_p13 = scmp.ge.s32.totalorder %s663_s17, 2  ;;  %s390_s15 = scalar_lea.sflag [#allocation4], %s389_s18 }
  0xdd   : > { %p487_p2 = pnand %p928_p13, %p927_p6 }
  0xdf   : > { %638 = dma.done.wait (!%p487_p2), %s390_s15, 1024  }
  0xe0   : > { %640 = vsyncadd (!%p487_p2), %s390_s15, 4294966272  ;;  %s19_s17 = sadd.s32 1, %s663_s17   ;;  %s929_s12 = smov %s647_s13 }
  0xe1   : > { %p16_p5 = scmp.ge.s32.totalorder %s19_s17, 4   ;;  %s930_s13 = smov %s651_s14 }
  0xe2   : > { %s931_s14 = smov %s748_s26  ;;  %s932_s15 = smov %s659_s16 }
  0xe3   : > { %s933_s16 = smov %s935_s20  ;;  %18 = sbr.rel (!%p16_p5) target bundleno = 6 (0x6), region = 77 }
  0xea   :  { %395 = vsyncpa [#allocation3], 1 }
  0xeb   :  { %397 = vsyncpa [#allocation3 + $0x1], 1 }
  0xec   :  { %398 = vsyncpa [#allocation4], 1 }
  0xed   :  { %400 = vsyncpa [#allocation4 + $0x1], 1 }

</bundles_post_ra>
